<compile_context>
chip_gen: v7x
topology: tpu7x:2x2x1
jax: 0.10.0
libtpu: 0.0.40
codegen_flags: <defaults>
</compile_context>

<pallas_src>
import functools

import numpy as np

import jax
import jax.numpy as jnp
from jax.experimental import pallas as pl
from jax.experimental.pallas import tpu as pltpu

_ALPHA = 0.05


def _f_critical_value(dfn, dfd, alpha):
    """Upper critical value of the F(dfn, dfd) distribution (SF(F_crit) = alpha).

    Computed once at setup time by bisection on the regularized incomplete beta
    function (df's are static), so the runtime forward path never evaluates
    betainc.
    """
    a = jnp.float32(dfd / 2.0)
    b = jnp.float32(dfn / 2.0)
    dfn_f = jnp.float32(dfn)
    dfd_f = jnp.float32(dfd)
    alpha_f = jnp.float32(alpha)

    def sf(f):  # survival function of F(dfn, dfd)
        return jax.scipy.special.betainc(a, b, dfd_f / (dfd_f + dfn_f * f))

    hi0 = jnp.float32(1e6)
    # Guard against the bracket silently clamping for tiny alpha / tiny dfd.
    assert float(sf(hi0)) < alpha, "F_crit bisection upper bound too small"

    def body(_, carry):
        lo, hi = carry
        mid = 0.5 * (lo + hi)
        go_right = sf(mid) > alpha_f          # SF is decreasing in F
        return jnp.where(go_right, mid, lo), jnp.where(go_right, hi, mid)

    lo, hi = jax.lax.fori_loop(0, 64, body, (jnp.float32(0.0), hi0))
    return float(0.5 * (lo + hi))


def _f_test_kernel(w_ref, x1_ref, x2_ref, f_ref, *, n):
    """One grid step == one batch element.

    w_ref  : (C_out, C_in)   f32 VMEM   1x1-conv weight (bias omitted: cancels)
    x1_ref : (C_in, HW)      f32 VMEM   activations of batch b (spatial flat)
    x2_ref : (C_in, HW)      f32 VMEM
    f_ref  : (1, C_out)      f32 VMEM   F statistic per out-channel for batch b
    """
    c_out = w_ref.shape[0]
    inv_n = jnp.float32(1.0 / n)
    dfw = jnp.float32(2 * n - 2)

    w = w_ref[...]                                              # (C_out, C_in)
    # 1x1 conv == channel matmul on the MXU (f32 accumulation).
    y1 = jnp.dot(w, x1_ref[...], preferred_element_type=jnp.float32)  # (C_out, HW)
    y2 = jnp.dot(w, x2_ref[...], preferred_element_type=jnp.float32)  # (C_out, HW)
    # Pack both groups along sublanes -> fully packed (2*C_out, HW) tiles for
    # the VPU/XLU work (2*C_out == 8 when in_ch // 16 == 4).
    y = jnp.concatenate([y1, y2], axis=0)                       # (2*C_out, HW)

    # Centered one-way ANOVA sums (numerically stable).
    s = jnp.sum(y, axis=1, keepdims=True)                       # (2*C_out, 1)
    mu = s * inv_n
    yc = y - mu
    q = jnp.sum(yc * yc, axis=1, keepdims=True)                 # within-group SS

    ssw = q[:c_out] + q[c_out:]                                  # (C_out, 1)
    dm = mu[:c_out] - mu[c_out:]
    ssb = jnp.float32(0.5 * n) * dm * dm                         # df_between = 1

    safe_ssw = jnp.where(ssw > 0, ssw, jnp.float32(1.0))
    f_col = jnp.where(
        ssw > 0,
        ssb * dfw / safe_ssw,
        jnp.where(ssb > 0, jnp.float32(jnp.inf), jnp.float32(jnp.nan)),
    )                                                            # (C_out, 1)
    f_ref[0, :] = f_col[:, 0]


def f_test_forward(x1, x2, weight, bias):
    """x1, x2: (B, C_in, H, W) NCHW.  weight: (C_out, C_in, 1, 1), bias: (C_out,).

    Returns (decision: Python bool, f_stats (B, C_out), n_significant: int).
    The conv bias is mathematically irrelevant to the F statistic, so it is not
    consumed by the kernel.
    """
    del bias  # F statistic is invariant to a per-channel additive constant.
    B, C_in, H, W = x1.shape
    C_out = weight.shape[0]
    HW = H * W
    # NOTE: for unaligned spatial sizes (H*W not a multiple of 128) the loads
    # become masked; padding would change the ANOVA sample count, so it is not
    # applied here.

    # Free layout ops only (merging trailing dims is a bitcast reshape).
    x1_k = x1.reshape(B, C_in, HW)
    x2_k = x2.reshape(B, C_in, HW)
    w_k = weight.reshape(C_out, C_in)

    f_crit = _f_critical_value(1, 2 * HW - 2, _ALPHA)

    # Per-step VMEM footprint: 2 inputs x 2 pipeline buffers x one batch block,
    # plus the resident weight and the tiny output block.  Bounded in B.
    block_bytes = C_in * HW * 4
    vmem_needed = 2 * 2 * block_bytes + (C_out * C_in + 2 * C_out) * 4
    vmem_limit = int(min(max(2 * vmem_needed, 32 << 20), 100 << 20))

    kernel = functools.partial(_f_test_kernel, n=HW)
    f_raw = pl.pallas_call(
        kernel,
        out_shape=jax.ShapeDtypeStruct((B, 1, C_out), jnp.float32),
        grid=(B,),
        in_specs=[
            pl.BlockSpec((C_out, C_in), lambda b: (0, 0)),          # weight, resident
            pl.BlockSpec((None, C_in, HW), lambda b: (b, 0, 0)),    # x1 batch block
            pl.BlockSpec((None, C_in, HW), lambda b: (b, 0, 0)),    # x2 batch block
        ],
        out_specs=pl.BlockSpec((None, 1, C_out), lambda b: (b, 0, 0)),
        compiler_params=pltpu.CompilerParams(
            dimension_semantics=("parallel",),
            vmem_limit_bytes=vmem_limit,
        ),
        cost_estimate=pl.CostEstimate(
            flops=4 * B * C_out * C_in * HW + 10 * B * 2 * C_out * HW,
            bytes_accessed=(2 * B * C_in * HW + C_out * C_in + B * C_out) * 4,
            transcendentals=0,
        ),
    )(w_k, x1_k, x2_k)

    f_stats = f_raw.reshape(B, C_out)

    # Significance count reduced in the wrapper (no cross-step accumulator in
    # the kernel, so the batch grid axis can be "parallel").  Comparison against
    # the static critical value: inf -> significant, nan -> not (scipy-like).
    n_sig = int(jnp.sum(f_stats > jnp.float32(f_crit)))
    # TODO(synk): the original module returns a host-side Python bool, which
    # forces a device->host sync here by construction.
    decision = (n_sig * 2) >= (B * C_out)
    return decision, f_stats, n_sig


def _reference(x1, x2, weight, bias, alpha=_ALPHA):
    """Pure-JAX reference of the original forward (conv + two-group ANOVA p-values)."""
    B, C_in, H, W = x1.shape
    C_out = weight.shape[0]
    HW = H * W
    w = weight.reshape(C_out, C_in)
    hp = jax.lax.Precision.HIGHEST
    y1 = jnp.einsum("oc,bcs->bos", w, x1.reshape(B, C_in, HW), precision=hp) \
        + bias[None, :, None]
    y2 = jnp.einsum("oc,bcs->bos", w, x2.reshape(B, C_in, HW), precision=hp) \
        + bias[None, :, None]
    m1 = y1.mean(-1, keepdims=True)
    m2 = y2.mean(-1, keepdims=True)
    ssw = ((y1 - m1) ** 2).sum(-1) + ((y2 - m2) ** 2).sum(-1)     # (B, C_out)
    ssb = (HW / 2.0) * (m1 - m2)[..., 0] ** 2
    dfw = 2 * HW - 2
    f = ssb * dfw / ssw
    d2 = jnp.float32(dfw)
    p = jax.scipy.special.betainc(d2 / 2.0, jnp.float32(0.5), d2 / (d2 + f))
    counts = int(jnp.sum(p < alpha))
    decision = counts * 2 >= B * C_out
    return f, counts, decision


if __name__ == "__main__":
    key = jax.random.PRNGKey(0)
    in_ch = 64                     # must be >= 16 so the conv has >= 1 output channel
    B, H, W = 2, 16, 16
    C_out = in_ch // 16

    k1, k2, k3, k4 = jax.random.split(key, 4)
    x1 = jax.random.normal(k1, (B, in_ch, H, W), jnp.float32)
    x2 = jax.random.normal(k2, (B, in_ch, H, W), jnp.float32) + 0.5

    # deterministic Conv2d(in_ch, in_ch//16, 1) params (PyTorch-style uniform bound)
    bound = 1.0 / (in_ch ** 0.5)
    weight = jax.random.uniform(k3, (C_out, in_ch, 1, 1), jnp.float32,
                                minval=-bound, maxval=bound)
    bias = jax.random.uniform(k4, (C_out,), jnp.float32,
                              minval=-bound, maxval=bound)

    decision, f_stats, n_sig = f_test_forward(x1, x2, weight, bias)
    jax.block_until_ready(f_stats)

    # sanity check against a pure-JAX reference (betainc only used here, not in forward)
    f_ref, counts_ref, decision_ref = _reference(x1, x2, weight, bias)
    assert np.allclose(np.asarray(f_stats), np.asarray(f_ref), rtol=5e-2, atol=1e-3), \
        "F-statistic mismatch vs reference"
    assert bool(decision) == bool(decision_ref), "decision mismatch vs reference"

    _ = bool(decision)             # module returns a Python True/False
    print("KERNEL_OK")
</pallas_src>

<mosaic_0001>
module attributes {stable_mosaic.version = 11 : i64} {
  func.func @_f_test_kernel(%arg0: i32, %arg1: memref<4x64xf32, #tpu.memory_space<vmem>>, %arg2: memref<1x64x256xf32, #tpu.memory_space<vmem>>, %arg3: memref<1x64x256xf32, #tpu.memory_space<vmem>>, %arg4: memref<1x1x4xf32, #tpu.memory_space<vmem>>) attributes {dimension_semantics = [#tpu.dimension_semantics<parallel>], iteration_bounds = array<i64: 2>, scalar_prefetch = 0 : i64, scratch_operands = 0 : i64, tpu.core_type = #tpu.core_type<tc>, window_params = [{pipeline_mode = #tpu.pipeline_mode<synchronous>, transform_indices = @transform_0, window_bounds = array<i64: 4, 64>}, {transform_indices = @transform_1, window_bounds = array<i64: 1, 64, 256>}, {transform_indices = @transform_2, window_bounds = array<i64: 1, 64, 256>}, {transform_indices = @transform_3, window_bounds = array<i64: 1, 1, 4>}]} {
    %c0 = arith.constant 0 : index
    %c0_0 = arith.constant 0 : index
    %0 = vector.load %arg1[%c0, %c0_0] : memref<4x64xf32, #tpu.memory_space<vmem>>, vector<4x64xf32>
    %c0_1 = arith.constant 0 : index
    %c0_2 = arith.constant 0 : index
    %c0_3 = arith.constant 0 : index
    %1 = vector.load %arg2[%c0_1, %c0_2, %c0_3] : memref<1x64x256xf32, #tpu.memory_space<vmem>>, vector<1x64x256xf32>
    %2 = vector.shape_cast %1 : vector<1x64x256xf32> to vector<64x256xf32>
    %cst = arith.constant dense<0.000000e+00> : vector<4x256xf32>
    %3 = tpu.matmul %0, %2, %cst {dimension_numbers = #tpu.dot_dimension_numbers<[1], [0], [0], [1], [0, 0, 1, 1], [], []>} : vector<4x64xf32>, vector<64x256xf32>, vector<4x256xf32> -> vector<4x256xf32>
    %c0_4 = arith.constant 0 : index
    %c0_5 = arith.constant 0 : index
    %c0_6 = arith.constant 0 : index
    %4 = vector.load %arg3[%c0_4, %c0_5, %c0_6] : memref<1x64x256xf32, #tpu.memory_space<vmem>>, vector<1x64x256xf32>
    %5 = vector.shape_cast %4 : vector<1x64x256xf32> to vector<64x256xf32>
    %cst_7 = arith.constant dense<0.000000e+00> : vector<4x256xf32>
    %6 = tpu.matmul %0, %5, %cst_7 {dimension_numbers = #tpu.dot_dimension_numbers<[1], [0], [0], [1], [0, 0, 1, 1], [], []>} : vector<4x64xf32>, vector<64x256xf32>, vector<4x256xf32> -> vector<4x256xf32>
    %7 = tpu.concatenate %3, %6 in 0 : vector<4x256xf32>, vector<4x256xf32> -> vector<8x256xf32>
    %cst_8 = arith.constant dense<0.000000e+00> : vector<8xf32>
    %8 = vector.multi_reduction <add>, %7, %cst_8 [1] : vector<8x256xf32> to vector<8xf32>
    %9 = vector.shape_cast %8 : vector<8xf32> to vector<8x1xf32>
    %cst_9 = arith.constant 3.906250e-03 : f32
    %10 = vector.broadcast %cst_9 : f32 to vector<8x1xf32>
    %11 = arith.mulf %9, %10 : vector<8x1xf32>
    %12 = vector.broadcast %11 : vector<8x1xf32> to vector<8x256xf32>
    %13 = arith.subf %7, %12 : vector<8x256xf32>
    %14 = arith.mulf %13, %13 : vector<8x256xf32>
    %cst_10 = arith.constant dense<0.000000e+00> : vector<8xf32>
    %15 = vector.multi_reduction <add>, %14, %cst_10 [1] : vector<8x256xf32> to vector<8xf32>
    %16 = vector.shape_cast %15 : vector<8xf32> to vector<8x1xf32>
    %17 = vector.extract_strided_slice %16 {offsets = [0, 0], sizes = [4, 1], strides = [1, 1]} : vector<8x1xf32> to vector<4x1xf32>
    %18 = vector.extract_strided_slice %16 {offsets = [4, 0], sizes = [4, 1], strides = [1, 1]} : vector<8x1xf32> to vector<4x1xf32>
    %19 = arith.addf %17, %18 : vector<4x1xf32>
    %20 = vector.extract_strided_slice %11 {offsets = [0, 0], sizes = [4, 1], strides = [1, 1]} : vector<8x1xf32> to vector<4x1xf32>
    %21 = vector.extract_strided_slice %11 {offsets = [4, 0], sizes = [4, 1], strides = [1, 1]} : vector<8x1xf32> to vector<4x1xf32>
    %22 = arith.subf %20, %21 : vector<4x1xf32>
    %cst_11 = arith.constant 1.280000e+02 : f32
    %23 = vector.broadcast %cst_11 : f32 to vector<4x1xf32>
    %24 = arith.mulf %23, %22 : vector<4x1xf32>
    %25 = arith.mulf %24, %22 : vector<4x1xf32>
    %cst_12 = arith.constant 0.000000e+00 : f32
    %26 = vector.broadcast %cst_12 : f32 to vector<4x1xf32>
    %27 = arith.cmpf ogt, %19, %26 : vector<4x1xf32>
    %cst_13 = arith.constant 1.000000e+00 : f32
    %28 = vector.broadcast %cst_13 : f32 to vector<4x1xf32>
    %29 = arith.select %27, %19, %28 : vector<4x1xi1>, vector<4x1xf32>
    %cst_14 = arith.constant 0.000000e+00 : f32
    %30 = vector.broadcast %cst_14 : f32 to vector<4x1xf32>
    %31 = arith.cmpf ogt, %19, %30 : vector<4x1xf32>
    %cst_15 = arith.constant 5.100000e+02 : f32
    %32 = vector.broadcast %cst_15 : f32 to vector<4x1xf32>
    %33 = arith.mulf %25, %32 : vector<4x1xf32>
    %34 = arith.divf %33, %29 : vector<4x1xf32>
    %cst_16 = arith.constant 0.000000e+00 : f32
    %35 = vector.broadcast %cst_16 : f32 to vector<4x1xf32>
    %36 = arith.cmpf ogt, %25, %35 : vector<4x1xf32>
    %cst_17 = arith.constant 0x7F800000 : f32
    %cst_18 = arith.constant 0x7FC00000 : f32
    %37 = vector.broadcast %cst_17 : f32 to vector<4x1xf32>
    %38 = vector.broadcast %cst_18 : f32 to vector<4x1xf32>
    %39 = arith.select %36, %37, %38 : vector<4x1xi1>, vector<4x1xf32>
    %40 = arith.select %31, %34, %39 : vector<4x1xi1>, vector<4x1xf32>
    %41 = vector.shape_cast %40 : vector<4x1xf32> to vector<4xf32>
    %c0_19 = arith.constant 0 : index
    %c0_20 = arith.constant 0 : index
    %c0_21 = arith.constant 0 : index
    %42 = vector.load %arg4[%c0_19, %c0_20, %c0_21] : memref<1x1x4xf32, #tpu.memory_space<vmem>>, vector<1x1x4xf32>
    %43 = vector.shape_cast %42 : vector<1x1x4xf32> to vector<4xf32>
    %44 = vector.shape_cast %41 : vector<4xf32> to vector<1x1x4xf32>
    tpu.vector_store %arg4[%c0_19, %c0_20, %c0_21], %44 {strides = array<i32>} : memref<1x1x4xf32, #tpu.memory_space<vmem>>, vector<1x1x4xf32>,
    return
  }
  func.func @transform_0(%arg0: i32) -> (i32, i32) {
    %c0_i32 = arith.constant 0 : i32
    %c0_i32_0 = arith.constant 0 : i32
    %c0_i32_1 = arith.constant 0 : i32
    return %c0_i32, %c0_i32_0 : i32, i32
  }
  func.func @transform_1(%arg0: i32) -> (i32, i32, i32) {
    %c0_i32 = arith.constant 0 : i32
    %c0_i32_0 = arith.constant 0 : i32
    %c0_i32_1 = arith.constant 0 : i32
    return %arg0, %c0_i32, %c0_i32_0 : i32, i32, i32
  }
  func.func @transform_2(%arg0: i32) -> (i32, i32, i32) {
    %c0_i32 = arith.constant 0 : i32
    %c0_i32_0 = arith.constant 0 : i32
    %c0_i32_1 = arith.constant 0 : i32
    return %arg0, %c0_i32, %c0_i32_0 : i32, i32, i32
  }
  func.func @transform_3(%arg0: i32) -> (i32, i32, i32) {
    %c0_i32 = arith.constant 0 : i32
    %c0_i32_0 = arith.constant 0 : i32
    %c0_i32_1 = arith.constant 0 : i32
    return %arg0, %c0_i32, %c0_i32_0 : i32, i32, i32
  }
}

</mosaic_0001>

<bundles_post_ra>
// kernel: tpu_custom_call.1
= control target key start
LH: loop header
LB: loop body
LE: loop exit
PB: predicated region body
PF: predicated region fallthrough
CT: control target
= control target key end

     0   :  { %8 = vsyncpa [#allocation3], 0  ;;  %s1177_s0 = inlined_call_operand.hbm [shape: f32[4,64], index: 0, kind: input, shape index: {}]   ;;  %s1178_s1 = inlined_call_operand.hbm [shape: f32[2,64,256], index: 1, kind: input, shape index: {}]   ;;  %s1179_s2 = inlined_call_operand.hbm [shape: f32[2,64,256], index: 2, kind: input, shape index: {}]   ;;  %s1180_s3 = inlined_call_operand.hbm [shape: f32[2,1,4], index: 3, kind: output, shape index: {}]  }
   0x1   :  { %9 = vsyncpa [#allocation6], 0 }
   0x2   :  { %11 = vsyncpa [#allocation6 + $0x1], 0 }
   0x3   :  { %12 = vsyncpa [#allocation4], 0 }
   0x4   :  { %14 = vsyncpa [#allocation4 + $0x1], 0  ;;  %s892_s12 = smov 0   ;;  %s894_s13 = smov 0  }
   0x5   :  { %s896_s14 = smov 0   ;;  %s898_s15 = smov 0  }
   0x6 LB: > { %s913_s16 = sadd.s32 1, %s861_s15   ;;  %s48_s17 = sadd.s32 1, %s857_s14  ;;  %s861_s15 = sphi %s898_s15, %s1203_s15   ;;  %s857_s14 = sphi %s896_s14, %s1202_s14   ;;  %s853_s13 = sphi %s894_s13, %s1201_s13   ;;  %s849_s12 = sphi %s892_s12, %s1200_s12  }
   0x7   : > { %s45_s18 = ssub.s32 %s861_s15, %s913_s16  ;;  %p55_p0 = scmp.ne.s32.totalorder %s857_s14, %s853_s13 }
   0x8   : > { %p46_p1 = scmp.eq.s32.totalorder %s45_s18, 0  ;;  %p56_p2 = scmp.eq.s32.totalorder %s861_s15, 0 }
   0x9   : > { %p658_p4 = scmp.lt.s32.totalorder %s861_s15, 2  ;;  %s148_s20 = sand.u32 1, %s861_s15  }
   0xa   : > { %s924_s19 = scalar_select %p46_p1, %s857_s14, %s48_s17  }
   0xb   : > { %p57_p5 = por %p56_p2, %p55_p0  ;;  %s150_s21 = sand.u32 1, %s857_s14  }
   0xc   : > { %s931_s22 = sshll.u32 %s150_s21, 7  ;;  %s598_s23 = sshll.u32 %s861_s15, 11 }
   0xd   : > { %s939_s26 = scalar_lea.hbm %s1178_s1, %s598_s23  ;;  %s152_s27 = scalar_lea.vmem [#allocation5], %s931_s22 }
   0xe   : > { %s159_s28 = sshll.u32 %s152_s27, 4  ;;  %p942_p6 = pnand %p658_p4, %p57_p5  ;;  %s946_s28 = int_to_ptr.vmem [resolvable:$true] %s159_s28 }
   0xf   : > { %s948_s30 = scalar_lea.sflag [#allocation6], %s148_s20  ;;  %s703_s4 = scalar_lea.hbm %s939_s26, 2048 }
  0x10   : > { %p704_p7 = scmp.ne.s32.totalorder %s939_s26, %s703_s4  ;;  %p705_p8 = pneg %p942_p6 }
  0x11   : > { %s708_s7 = scalar_lea.hbm %s1178_s1, 4096  ;;  %p709_p11 = scmp.lt.u32.totalorder %s939_s26, %s1178_s1 }
  0x12   : > { %p706_p9 = pnand %p705_p8, %p704_p7  ;;  %p710_p12 = scmp.lt.u32.totalorder %s708_s7, %s703_s4 }
  0x13   : > { %p712_p1 = scmp.lt.u32.totalorder %s703_s4, %s939_s26 }
  0x14   : > { %p707_p10 = pneg %p706_p9  ;;  %p711_p13 = por %p710_p12, %p709_p11 }
  0x16   : > { %p713_p2 = por %p712_p1, %p711_p13 }
  0x18   : > { %p714_p4 = pnand %p713_p2, %p707_p10 }
  0x1a   : > { %717 = shalt.err (!%p714_p4)
}
  0x1b   : > { %s718_s10 = scalar_lea.vmem %s946_s28, 2048  ;;  %s863_s11 = smov [#allocation5]  }
  0x1c   : > { %p719_p5 = scmp.ne.s32.totalorder %s946_s28, %s718_s10  ;;  %s723_s17 = sshll.u32 %s863_s11, 4  ;;  %s724_s17 = int_to_ptr.vmem [resolvable:$false] %s723_s17 }
  0x1d   : > { %s725_s18 = scalar_lea.vmem %s724_s17, 4096  ;;  %p726_p3 = scmp.lt.s32.totalorder %s946_s28, %s724_s17 }
  0x1e   : > { %p721_p7 = pnand %p719_p5, %p705_p8  ;;  %p727_p11 = scmp.lt.s32.totalorder %s725_s18, %s718_s10 }
  0x20   : > { %p722_p9 = pneg %p721_p7  ;;  %p728_p12 = por %p727_p11, %p726_p3 }
  0x22   : > { %p729_p13 = pnand %p728_p12, %p722_p9 }
  0x24   : > { %732 = shalt.err (!%p729_p13)
}
  0x25   : > { %s864_s20 = smov 256   ;;  %s865_s21 = smov 16  }
  0x26   : > { %649 = dma.hbm_to_vmem [thread:$0]  (!%p942_p6), %s939_s26, 2048, %s946_s28, %s948_s30, %s864_s20, %s864_s20, %s865_s21  }
  0x27   : > { %s173_s24 = scalar_lea.vmem [#allocation7], %s931_s22  ;;  %s981_s27 = sadd.s32 4294967295, %s861_s15  }
  0x28   : > { %s180_s25 = sshll.u32 %s173_s24, 4  ;;  %s579_s4 = sadd.s32 4294967294, %s861_s15   ;;  %s1014_s25 = int_to_ptr.vmem [resolvable:$true] %s180_s25 }
  0x29   : > { %p61_p3 = scmp.ne.s32.totalorder %s853_s13, %s849_s12  ;;  %p1181_p10 = scmp.eq.s32.totalorder %s981_s27, 0 }
  0x2a   : > { %p111_p1 = scmp.eq.s32.totalorder %s981_s27, 1  ;;  %p117_p2 = scmp.eq.s32.totalorder %s579_s4, 1 }
  0x2b   : > { %p990_p4 = por %p1181_p10, %p61_p3  ;;  %p580_p5 = scmp.ge.s32.totalorder %s861_s15, 1 }
  0x2c   : > { %p998_p7 = por %p111_p1, %p55_p0  ;;  %p1002_p9 = por %p117_p2, %p61_p3 }
  0x2d   : > { %s1186_s5 = scalar_select %p990_p4, 1, 0 }
  0x2e   : > { %s1187_s22 = scalar_select %p998_p7, 1, 0 }
  0x2f   : > { %s1188_s26 = scalar_select %p1002_p9, 1, 0 }
  0x30   : > { %p124_p11 = scmp.lt.s32.totalorder %s861_s15, 3  ;;  %s1012_s7 = scalar_lea.hbm %s1179_s2, %s598_s23 }
  0x31   : > { %s866_s9 = smov [#allocation2]   ;;  %s733_s11 = scalar_lea.hbm %s1012_s7, 2048 }
  0x32   : > { %p1016_p0 = pnand %p580_p5, %p124_p11  ;;  %s1020_s10 = sshll.u32 %s866_s9, 4  ;;  %s138_s10 = int_to_ptr.vmem [resolvable:$true] %s1020_s10 }
  0x33   : > { %p734_p13 = scmp.ne.s32.totalorder %s1012_s7, %s733_s11  ;;  %s738_s18 = scalar_lea.hbm %s1179_s2, 4096 }
  0x34   : > { %s1189_s8 = scalar_select %p1016_p0, 1, 0 }
  0x35   : > { %p736_p3 = pnand %p734_p13, %p705_p8  ;;  %p739_p2 = scmp.lt.u32.totalorder %s1012_s7, %s1179_s2 }
  0x36   : > { %p740_p5 = scmp.lt.u32.totalorder %s738_s18, %s733_s11  ;;  %p742_p10 = scmp.lt.u32.totalorder %s733_s11, %s1012_s7 }
  0x37   : > { %p737_p1 = pneg %p736_p3 }
  0x38   : > { %p741_p11 = por %p740_p5, %p739_p2 }
  0x3a   : > { %p743_p9 = por %p742_p10, %p741_p11 }
  0x3c   : > { %p744_p7 = pnand %p743_p9, %p737_p1 }
  0x3e   : > { %747 = shalt.err (!%p744_p7)
}
  0x3f   : > { %s748_s28 = scalar_lea.vmem %s1014_s25, 2048  ;;  %s867_s6 = smov [#allocation7]  }
  0x40   : > { %p749_p13 = scmp.ne.s32.totalorder %s1014_s25, %s748_s28  ;;  %s753_s9 = sshll.u32 %s867_s6, 4  ;;  %s754_s9 = int_to_ptr.vmem [resolvable:$false] %s753_s9 }
  0x41   : > { %s755_s23 = scalar_lea.vmem %s754_s9, 4096  ;;  %p756_p4 = scmp.lt.s32.totalorder %s1014_s25, %s754_s9 }
  0x42   : > { %p751_p3 = pnand %p749_p13, %p705_p8  ;;  %p757_p2 = scmp.lt.s32.totalorder %s755_s23, %s748_s28 }
  0x44   : > { %p752_p12 = pneg %p751_p3  ;;  %p758_p5 = por %p757_p2, %p756_p4 }
  0x46   : > { %p759_p10 = pnand %p758_p5, %p752_p12 }
  0x48   : > { %762 = shalt.err (!%p759_p10)
}
  0x49   : > { %652 = dma.hbm_to_vmem [thread:$0]  (!%p942_p6), %s1012_s7, 2048, %s1014_s25, %s948_s30, %s864_s20, %s864_s20, %s865_s21  }
  0x4a   : > { %p1190_p8 = scmp.eq.s32.totalorder %s981_s27, 0  ;;  %p1191_p7 = pneg %p1016_p0 }
  0x4b   : > { %s763_s18 = scalar_lea.hbm %s1177_s0, 64 }
  0x4c   : > { %p1057_p9 = pnand %p1191_p7, %p1190_p8  ;;  %p764_p4 = scmp.ne.s32.totalorder %s1177_s0, %s763_s18 }
  0x4d   : > { %p770_p11 = scmp.lt.u32.totalorder %s763_s18, %s1177_s0 }
  0x4e   : > { %p765_p12 = pneg %p1057_p9 }
  0x50   : > { %p766_p6 = pnand %p765_p12, %p764_p4 }
  0x52   : > { %p767_p1 = pneg %p766_p6 }
  0x54   : > { %p772_p13 = pnand %p770_p11, %p767_p1 }
  0x56   : > { %775 = shalt.err (!%p772_p13)
}
  0x57   : > { %s776_s21 = scalar_lea.vmem %s138_s10, 64  ;;  %p784_p10 = scmp.lt.s32.totalorder %s138_s10, %s138_s10 }
  0x58   : > { %p777_p3 = scmp.ne.s32.totalorder %s138_s10, %s776_s21  ;;  %p785_p8 = scmp.lt.s32.totalorder %s776_s21, %s776_s21 }
  0x5a   : > { %p779_p2 = pnand %p777_p3, %p765_p12  ;;  %p786_p7 = por %p785_p8, %p784_p10 }
  0x5c   : > { %p780_p5 = pneg %p779_p2 }
  0x5e   : > { %p787_p0 = pnand %p786_p7, %p780_p5 }
  0x60   : > { %790 = shalt.err (!%p787_p0)
}
  0x61   : > { %645 = dma.hbm_to_vmem [thread:$0]  (!%p1057_p9), %s1177_s0, 64, %s138_s10, [#allocation3]  }
  0x62   : > { %p1193_p4 = scmp.ne.s32.totalorder %s1189_s8, 0 }
  0x63   : > { %p1194_p6 = scmp.eq.s32.totalorder (!%p1193_p4), %s981_s27, 0 }
  0x64   : > { %192 = sbr.rel (%p1193_p4) target bundleno = 807 (0x327), region = 32 }
  0x6b   : > { %836 = dma.done.wait (%p1194_p6), [#allocation3], 64   ;;  %p1195_p12 = pmov %p1194_p6 }
  0x6c   : > { %s198_s28 = sand.u32 1, %s981_s27   ;;  %s1085_s6 = sand.u32 1, %s853_s13  }
  0x6d   : > { %838 = vsyncadd (%p1195_p12), [#allocation3], 4294967232  ;;  %s591_s9 = sshll.u32 %s1085_s6, 7  ;;  %s199_s23 = scalar_lea.sflag [#allocation6], %s198_s28 }
  0x6e   : > { %s1088_s11 = scalar_lea.vmem [#allocation5], %s591_s9  ;;  %p1196_p0 = scmp.ne.s32.totalorder %s1186_s5, 0 }
  0x70   : > { %840 = dma.done.wait (%p1196_p0), %s199_s23, 4096  }
  0x71   : > { %842 = vsyncadd (%p1196_p0), %s199_s23, 4294963200  ;;  %v868_v0 = vmov 0.0   ;;  %s1094_s8 = scalar_lea.vmem [#allocation7], %s591_s9  ;;  %v240_v3 = vld [vmem:[%s1088_s11 + $0x8] sm:$0xff]  ;;  %v242_v5 = vld [vmem:[%s1088_s11 + $0x18] sm:$0xff]  ;;  %vm255_vm0 = vcmask 523264  }
  0x72   : > { %410 = vmatprep.mubr.f32.mxu1 %v868_v0  ;;  %323 = vmatprep.mubr.f32.mxu0 %v868_v0  ;;  %v331_v1 = vld [vmem:[%s1094_s8 + $0x8] sm:$0xff]  ;;  %v333_v2 = vld [vmem:[%s1094_s8 + $0x18] sm:$0xff]  ;;  %v330_v6 = vld [vmem:[%s1094_s8] sm:$0xff]  ;;  %v600_v8 = vpack.c.bf16 %v242_v5, %v240_v3  ;;  %vm423_vm1 = vcmask 1043456   ;;  %s595_s5 = sshll.u32 %s981_s27, 4  ;;  %s237_s10 = scalar_lea.vmem [#allocation8], %s1085_s6 }
  0x73   : > { %v616_v4 = vpack.c.bf16 %v333_v2, %v331_v1  ;;  %v332_v7 = vld [vmem:[%s1094_s8 + $0x10] sm:$0xff]  ;;  %v239_v10 = vld [vmem:[%s1088_s11] sm:$0xff]  ;;  %v335_v12 = vld [vmem:[%s1094_s8 + $0x28] sm:$0xff]  ;;  %v869_v2 = vmov 0   ;;  %s481_s17 = sshll.u32 %s237_s10, 4  ;;  %vm466_vm4 = vcmask 24576   ;;  %s1133_s24 = scalar_lea.hbm %s1180_s3, %s595_s5  ;;  %s1135_s17 = int_to_ptr.vmem [resolvable:$true] %s481_s17 }
  0x74   : > { %v618_v9 = vpack.c.bf16 %v332_v7, %v330_v6  ;;  %v241_v11 = vld [vmem:[%s1088_s11 + $0x10] sm:$0xff]  ;;  %v337_v14 = vld [vmem:[%s1094_s8 + $0x38] sm:$0xff]  ;;  %v244_v15 = vld [vmem:[%s1088_s11 + $0x28] sm:$0xff]  ;;  %601 = vmatprep.subr.bf16.mxu0 %v600_v8  ;;  %699 = vset.pattern.permute.xlu1 %v869_v2  ;;  %s469_s4 = scalar_lea.sflag [#allocation4], %s1085_s6  ;;  %s791_s30 = scalar_lea.vmem %s1135_s17, 16 }
  0x75   : > { %617 = vmatprep.subr.bf16.mxu1 %v616_v4  ;;  %v602_v13 = vpack.c.bf16 %v241_v11, %v239_v10  ;;  %v246_v16 = vld [vmem:[%s1088_s11 + $0x38] sm:$0xff]  ;;  %v620_v17 = vpack.c.bf16 %v337_v14, %v335_v12  ;;  %v334_v19 = vld [vmem:[%s1094_s8 + $0x20] sm:$0xff]  ;;  %v336_v20 = vld [vmem:[%s1094_s8 + $0x30] sm:$0xff]  ;;  %700 = vset.pattern.permute.xlu0 %v869_v2  ;;  %v870_v14 = vmov nan   ;;  %p792_p9 = scmp.ne.s32.totalorder %s1135_s17, %s791_s30  ;;  %p1197_p1 = scmp.ne.s32.totalorder %s1187_s22, 0 }
  0x76   : > { %619 = vmatpush1.bf16.msra.mxu1 %v618_v9  ;;  %v604_v18 = vpack.c.bf16 %v246_v16, %v244_v15  ;;  %v243_v21 = vld [vmem:[%s1088_s11 + $0x20] sm:$0xff]  ;;  %v622_v22 = vpack.c.bf16 %v336_v20, %v334_v19  ;;  %v245_v23 = vld [vmem:[%s1088_s11 + $0x30] sm:$0xff]  ;;  %v339_v24 = vld [vmem:[%s1094_s8 + $0x48] sm:$0xff]  ;;  %s871_s27 = smov [#allocation8]  }
  0x77   : > { %603 = vmatpush1.bf16.msra.mxu0 %v602_v13  ;;  %v341_v25 = vld [vmem:[%s1094_s8 + $0x58] sm:$0xff]  ;;  %621 = vmatprep.subr.bf16.mxu1 %v620_v17  ;;  %v606_v26 = vpack.c.bf16 %v245_v23, %v243_v21  ;;  %v248_v28 = vld [vmem:[%s1088_s11 + $0x48] sm:$0xff]  ;;  %v338_v30 = vld [vmem:[%s1094_s8 + $0x40] sm:$0xff]  ;;  %v459_v17 = vlaneseq  ;;  %p793_p11 = pnand %p792_p9, %p1197_p1  ;;  %s795_s20 = sshll.u32 %s871_s27, 4  ;;  %s796_s20 = int_to_ptr.vmem [resolvable:$false] %s795_s20 }
  0x78   : > { %605 = vmatprep.subr.bf16.mxu0 %v604_v18  ;;  %v624_v27 = vpack.c.bf16 %v341_v25, %v339_v24  ;;  %v250_v29 = vld [vmem:[%s1088_s11 + $0x58] sm:$0xff]  ;;  %v340_v32 = vld [vmem:[%s1094_s8 + $0x50] sm:$0xff]  ;;  %v247_v33 = vld [vmem:[%s1088_s11 + $0x40] sm:$0xff]  ;;  %s797_s21 = scalar_lea.vmem %s796_s20, 32  ;;  %p798_p3 = scmp.lt.s32.totalorder %s1135_s17, %s796_s20 }
  0x79   : > { %v608_v31 = vpack.c.bf16 %v250_v29, %v248_v28  ;;  %v249_v34 = vld [vmem:[%s1088_s11 + $0x50] sm:$0xff]  ;;  %v626_v35 = vpack.c.bf16 %v340_v32, %v338_v30  ;;  %v343_v36 = vld [vmem:[%s1094_s8 + $0x68] sm:$0xff]  ;;  %v345_v37 = vld [vmem:[%s1094_s8 + $0x78] sm:$0xff]  ;;  %v460_v18 = vand.u32 127, %v459_v17  ;;  %v462_v19 = vshrl.u32 %v459_v17, 7  ;;  %p794_p13 = pneg %p793_p11  ;;  %p799_p2 = scmp.lt.s32.totalorder %s797_s21, %s791_s30 }
  0x7a   : > { %623 = vmatpush1.bf16.msra.mxu1 %v622_v22  ;;  %v252_v38 = vld [vmem:[%s1088_s11 + $0x68] sm:$0xff]  ;;  %v610_v39 = vpack.c.bf16 %v249_v34, %v247_v33  ;;  %v628_v40 = vpack.c.bf16 %v345_v37, %v343_v36  ;;  %v254_v41 = vld [vmem:[%s1088_s11 + $0x78] sm:$0xff]  ;;  %v342_v42 = vld [vmem:[%s1094_s8 + $0x60] sm:$0xff] }
  0x7b   : > { %607 = vmatpush1.bf16.msra.mxu0 %v606_v26  ;;  %625 = vmatprep.subr.bf16.mxu1 %v624_v27  ;;  %v344_v43 = vld [vmem:[%s1094_s8 + $0x70] sm:$0xff]  ;;  %v612_v44 = vpack.c.bf16 %v254_v41, %v252_v38  ;;  %v251_v45 = vld [vmem:[%s1088_s11 + $0x60] sm:$0xff]  ;;  %v238_v49 = vld [vmem:[#allocation2] sm:$0xf]  ;;  %v463_v20 = vsub.s32 %v460_v18, %v462_v19  ;;  %p800_p5 = por %p799_p2, %p798_p3 }
  0x7c   : > { %609 = vmatprep.subr.bf16.mxu0 %v608_v31  ;;  %v253_v46 = vld [vmem:[%s1088_s11 + $0x70] sm:$0xff]  ;;  %v630_v47 = vpack.c.bf16 %v344_v43, %v342_v42 }
  0x7d   : > { %v614_v48 = vpack.c.bf16 %v253_v46, %v251_v45  ;;  %p801_p10 = pnand %p800_p5, %p794_p13 }
  0x7e   : > { %627 = vmatpush1.bf16.msra.mxu1 %v626_v35 }
  0x7f   : > { %611 = vmatpush1.bf16.msra.mxu0 %v610_v39  ;;  %629 = vmatprep.subr.bf16.mxu1 %v628_v40 }
  0x80   : > { %613 = vmatprep.subr.bf16.mxu0 %v612_v44 }
  0x82   : > { %631 = vmatpush1.bf16.msra.mxu1 %v630_v47 }
  0x83   : > { %615 = vmatpush1.bf16.msra.mxu0 %v614_v48 }
  0x85   : > { %594 = vmatmul.mubr.msk.f32.vlgmr.msra.gmra.mrb[0].mxu1 %vm255_vm0, %v238_v49 }
  0x86   : > { %593 = vmatmul.mubr.msk.f32.vlgmr.msra.gmra.mrb[0].mxu0 %vm255_vm0, %v238_v49 }
 0x158   : > { %v412_v50 = vpop.f32.mrb[0].mxu1 }
 0x159   : > { %v419_v51 = vrot.slane %v412_v50, 4  ;;  %v325_v52 = vpop.f32.mrb[0].mxu0  ;;  %v414_v53 = vpop.f32.mrb[1].mxu1 }
 0x15a   : > { %v420_v54 = vrot.slane %v414_v53, 4  ;;  %v327_v55 = vpop.f32.mrb[1].mxu0 }
 0x15b   : > { %v424_v56 = vsel %vm423_vm1, %v325_v52, %v419_v51 }
 0x15c   : > { %v425_v57 = vsel %vm423_vm1, %v327_v55, %v420_v54 }
 0x15d   : > { %v426_v58 = vadd.f32 %v425_v57, %v424_v56 }
 0x15f   : > { %427 = vadd.xlane.f32.xlu0 %v426_v58 }
 0x1ec   : > { %v428_v59 = vpop.xlane.xlu0 %427 }
 0x1ed   : > { %v429_v60 = vmul.f32 0.00390625, %v428_v59 }
 0x1ef   : > { %v430_v61 = vsub.f32 %v424_v56, %v429_v60  ;;  %v431_v62 = vsub.f32 %v425_v57, %v429_v60  ;;  %v442_v3 = vrot.slane %v429_v60, 4 }
 0x1f1   : > { %v432_v63 = vmul.f32 %v430_v61, %v430_v61  ;;  %v433_v0 = vmul.f32 %v431_v62, %v431_v62  ;;  %v444_v7 = vsub.f32 %v429_v60, %v442_v3 }
 0x1f3   : > { %v434_v1 = vadd.f32 %v433_v0, %v432_v63  ;;  %v445_v9 = vmul.f32 128.0, %v444_v7 }
 0x1f5   : > { %435 = vadd.xlane.f32.xlu0 %v434_v1  ;;  %v446_v10 = vmul.f32 %v445_v9, %v444_v7 }
 0x1f7   : > { %v449_v11 = vmul.f32 510.0, %v446_v10  ;;  %vm452_vm3 = vcmp.gt.f32.partialorder %v446_v10, 0.0 }
 0x1f8   : > { %v453_v15 = vsel %vm452_vm3, inf, %v870_v14 }
 0x282   : > { %v436_v4 = vpop.xlane.xlu0 %435 }
 0x283   : > { %v438_v5 = vrot.slane %v436_v4, 4 }
 0x285   : > { %v440_v6 = vadd.f32 %v438_v5, %v436_v4 }
 0x287   : > { %vm447_vm2 = vcmp.gt.f32.partialorder %v440_v6, 0.0 }
 0x288   : > { %v448_v8 = vsel %vm447_vm2, %v440_v6, 1.0 }
 0x289   : > { %701 = vrcp.f32 %v448_v8 }
 0x293   : > { %v702_v12 = vpop.eup %701 }
 0x294   : > { %v451_v13 = vmul.f32 %v702_v12, %v449_v11 }
 0x296   : > { %v454_v16 = vsel %vm447_vm2, %v451_v13, %v453_v15 }
 0x297   : > { %457 = vperm.xlu1 %699, %v454_v16  }
 0x316   : > { %v458_v21 = vpop.permute.xlu1 %457 }
 0x317   : > { %v464_v22 = vrot.slane %v458_v21, %v463_v20 }
 0x319   : > { %467 = vst.msk [vmem:[%s237_s10] sm:$0x1] %vm466_vm4, %v464_v22 }
 0x31a   : > { %804 = shalt.err (!%p801_p10)
}
 0x31b   : > { %s805_s25 = scalar_lea.hbm %s1133_s24, 16  ;;  %s809_s6 = scalar_lea.hbm %s1180_s3, 32 }
 0x31c   : > { %p806_p8 = scmp.ne.s32.totalorder %s1133_s24, %s805_s25  ;;  %p810_p6 = scmp.lt.u32.totalorder %s1133_s24, %s1180_s3 }
 0x31d   : > { %p811_p12 = scmp.lt.u32.totalorder %s809_s6, %s805_s25  ;;  %p813_p9 = scmp.lt.u32.totalorder %s805_s25, %s1133_s24 }
 0x31e   : > { %p807_p7 = pnand %p806_p8, %p1197_p1 }
 0x31f   : > { %p812_p0 = por %p811_p12, %p810_p6 }
 0x320   : > { %p808_p4 = pneg %p807_p7 }
 0x321   : > { %p814_p11 = por %p813_p9, %p812_p0 }
 0x323   : > { %p815_p13 = pnand %p814_p11, %p808_p4 }
 0x325   : > { %818 = shalt.err (!%p815_p13)
}
 0x326   : > { %640 = dma.vmem_to_hbm [thread:$0]  (%p1197_p1), %s1135_s17, 16, %s1133_s24, %s469_s4  }
 0x327 PF: > { %s493_s11 = sand.u32 1, %s849_s12   ;;  %p1198_p3 = scmp.ne.s32.totalorder %s1188_s26, 0 }
 0x328   : > { %p1199_p2 = scmp.ge.s32.totalorder %s861_s15, 2  ;;  %s494_s8 = scalar_lea.sflag [#allocation4], %s493_s11 }
 0x32a   : > { %p654_p5 = pnand %p1199_p2, %p1198_p3 }
 0x32c   : > { %844 = dma.done.wait (!%p654_p5), %s494_s8, 16  }
 0x32d   : > { %846 = vsyncadd (!%p654_p5), %s494_s8, 4294967280  ;;  %p17_p10 = scmp.ge.s32.totalorder %s913_s16, 4   ;;  %s1200_s12 = smov %s853_s13 }
 0x32e   : > { %s1201_s13 = smov %s857_s14  ;;  %s1202_s14 = smov %s924_s19 }
 0x32f   : > { %s1203_s15 = smov %s913_s16  ;;  %19 = sbr.rel (!%p17_p10) target bundleno = 6 (0x6), region = 93 }
 0x336   :  { %498 = vsyncpa [#allocation3], 1 }
 0x337   :  { %500 = vsyncpa [#allocation3 + $0x1], 1 }
 0x338   :  { %501 = vsyncpa [#allocation6], 1 }
 0x339   :  { %503 = vsyncpa [#allocation6 + $0x1], 1 }
 0x33a   :  { %504 = vsyncpa [#allocation4], 1 }
 0x33b   :  { %506 = vsyncpa [#allocation4 + $0x1], 1 }

</bundles_post_ra>
